<compile_context>
chip_gen: v7x
topology: tpu7x:2x2x1
jax: 0.10.0
libtpu: 0.0.40
codegen_flags: <defaults>
</compile_context>

<pallas_src>
import math

import jax
import jax.numpy as jnp
from jax.experimental import pallas as pl
from jax.experimental.pallas import tpu as pltpu

HIDDEN = 256
_LANE = 128
# Double-buffered (2048, state_dim) f32 x tiles + (2048, 128) f32 out tiles plus the
# VMEM-resident weights total ~3 MiB -> comfortably under v7x's 32 MiB scoped VMEM
# default (and trivially under v5e/v6e's 128 MiB).
_MAX_BATCH_TILE = 2048


def _round_up(n, m):
    return (n + m - 1) // m * m


def actor_critic_kernel(
    x_ref,              # (BM, state_dim)   f32
    w1_ref, b1_ref,     # (state_dim, 256)  bf16, (1, 256) f32
    w2_ref, b2_ref,     # (256, 256)        bf16, (1, 256) f32
    wh_ref, bh_ref,     # (256, head_pad)   bf16 (= [Wa | Wc | 0]), (1, head_pad) f32
    out_ref,            # (BM, head_pad)    f32  (= [logits | value | zeros])
):
    # Cast x to bf16 inside the kernel (no wrapper copy / pad pass).
    x = x_ref[...].astype(jnp.bfloat16)

    # fc1 + relu (MXU bf16 matmul, f32 accumulate; bias/ReLU in f32)
    h1 = jnp.dot(x, w1_ref[...], preferred_element_type=jnp.float32) + b1_ref[...]
    h1 = jnp.maximum(h1, 0.0).astype(jnp.bfloat16)

    # fc2 + relu
    h2 = jnp.dot(h1, w2_ref[...], preferred_element_type=jnp.float32) + b2_ref[...]
    h2 = jnp.maximum(h2, 0.0).astype(jnp.bfloat16)

    # fused actor+critic head -> single lane-dense (BM, 128) unmasked store
    out_ref[...] = (
        jnp.dot(h2, wh_ref[...], preferred_element_type=jnp.float32) + bh_ref[...]
    ).astype(out_ref.dtype)


def prepare_actor_critic_params(params):
    """One-time prep: fuse actor/critic heads, pad head to 128 lanes, cast to bf16.

    Call this once after (re)initializing/updating the raw params; the returned dict
    is what actor_critic_forward consumes every step (no per-call padding/casting).
    "action_dim" is stored as a plain Python int (keep it static if you jit).
    """
    action_dim = params["wa"].shape[1]
    head_w = action_dim + 1                      # logits | value
    head_pad = _round_up(head_w, _LANE)          # exactly 128 for small action_dim
    f32, bf16 = jnp.float32, jnp.bfloat16

    wh = (
        jnp.zeros((HIDDEN, head_pad), f32)
        .at[:, :action_dim].set(params["wa"])
        .at[:, action_dim:head_w].set(params["wc"])
        .astype(bf16)
    )
    bh = (
        jnp.zeros((1, head_pad), f32)
        .at[:, :action_dim].set(params["ba"])
        .at[:, action_dim:head_w].set(params["bc"])
    )
    return {
        "w1": params["w1"].astype(bf16), "b1": params["b1"].astype(f32),
        "w2": params["w2"].astype(bf16), "b2": params["b2"].astype(f32),
        "wh": wh, "bh": bh,
        "action_dim": action_dim,
    }


def actor_critic_forward(x, prep):
    """x: (B, state_dim) float32. prep: output of prepare_actor_critic_params."""
    B, state_dim = x.shape
    assert prep["w1"].shape[0] == state_dim
    action_dim = prep["action_dim"]
    head_pad = prep["wh"].shape[1]

    # --- batch tiling: balanced tiles, >=2 grid steps when worthwhile (v7x megacore)
    b8 = _round_up(B, 8)
    n_tiles = pl.cdiv(b8, _MAX_BATCH_TILE)
    if b8 >= 64:
        n_tiles = max(n_tiles, 2)
    bm = _round_up(pl.cdiv(b8, n_tiles), 8)
    grid = (pl.cdiv(B, bm),)

    resident = lambda shape: pl.BlockSpec(shape, lambda i: (0,) * len(shape))
    in_specs = [
        pl.BlockSpec((bm, state_dim), lambda i: (i, 0)),       # x: tiled over batch
        resident(prep["w1"].shape), resident(prep["b1"].shape),  # fc1 (VMEM-resident)
        resident(prep["w2"].shape), resident(prep["b2"].shape),  # fc2
        resident(prep["wh"].shape), resident(prep["bh"].shape),  # fused head
    ]
    out_spec = pl.BlockSpec((bm, head_pad), lambda i: (i, 0))
    out_shape = jax.ShapeDtypeStruct((B, head_pad), jnp.float32)

    flops = 2 * B * (state_dim * HIDDEN + HIDDEN * HIDDEN + HIDDEN * head_pad)
    bytes_accessed = (
        x.size * x.dtype.itemsize
        + sum(prep[k].size * prep[k].dtype.itemsize
              for k in ("w1", "b1", "w2", "b2", "wh", "bh"))
        + B * head_pad * 4
    )

    out = pl.pallas_call(
        actor_critic_kernel,
        out_shape=out_shape,
        grid=grid,
        in_specs=in_specs,
        out_specs=out_spec,
        compiler_params=pltpu.CompilerParams(
            dimension_semantics=("parallel",),
        ),
        cost_estimate=pl.CostEstimate(
            flops=flops, transcendentals=0, bytes_accessed=bytes_accessed
        ),
    )(x, prep["w1"], prep["b1"], prep["w2"], prep["b2"], prep["wh"], prep["bh"])

    logits = out[:, :action_dim]
    value = out[:, action_dim:action_dim + 1]
    return logits, value


def init_actor_critic_params(key, state_dim, action_dim):
    """Deterministic init matching nn.Linear's default U(-1/sqrt(fan_in), 1/sqrt(fan_in)).

    Weights stored as (in_features, out_features); biases as (1, out_features) so they
    broadcast over the batch (sublane) axis inside the kernel.
    """
    def linear(key, fan_in, fan_out):
        kw, kb = jax.random.split(key)
        bound = 1.0 / math.sqrt(fan_in)
        w = jax.random.uniform(kw, (fan_in, fan_out), jnp.float32, -bound, bound)
        b = jax.random.uniform(kb, (1, fan_out), jnp.float32, -bound, bound)
        return w, b

    k1, k2, k3, k4 = jax.random.split(key, 4)
    w1, b1 = linear(k1, state_dim, HIDDEN)
    w2, b2 = linear(k2, HIDDEN, HIDDEN)
    wa, ba = linear(k3, HIDDEN, action_dim)
    wc, bc = linear(k4, HIDDEN, 1)
    return {"w1": w1, "b1": b1, "w2": w2, "b2": b2,
            "wa": wa, "ba": ba, "wc": wc, "bc": bc}


def _reference_forward(x, p):
    """Reference with the same bf16 operand cast / f32 accumulate as the kernel."""
    bf = lambda a: a.astype(jnp.bfloat16).astype(jnp.float32)
    h1 = jnp.maximum(bf(x) @ bf(p["w1"]) + p["b1"], 0.0)
    h2 = jnp.maximum(bf(h1) @ bf(p["w2"]) + p["b2"], 0.0)
    logits = bf(h2) @ bf(p["wa"]) + p["ba"]
    value = bf(h2) @ bf(p["wc"]) + p["bc"]
    return logits, value


if __name__ == "__main__":
    key = jax.random.PRNGKey(0)
    k_param, k_x = jax.random.split(key)

    batch, state_dim, action_dim = 8, 16, 4
    params = init_actor_critic_params(k_param, state_dim, action_dim)
    prep = prepare_actor_critic_params(params)   # one-time prep, reused every step
    x = jax.random.normal(k_x, (batch, state_dim), jnp.float32)

    logits, value = actor_critic_forward(x, prep)
    jax.block_until_ready((logits, value))

    ref_logits, ref_value = _reference_forward(x, params)
    assert logits.shape == (batch, action_dim) and value.shape == (batch, 1)
    assert jnp.allclose(logits, ref_logits, atol=1e-2, rtol=1e-2)
    assert jnp.allclose(value, ref_value, atol=1e-2, rtol=1e-2)

    print("KERNEL_OK")
</pallas_src>

<mosaic_0001>
module attributes {stable_mosaic.version = 11 : i64} {
  func.func @actor_critic_kernel(%arg0: i32, %arg1: memref<8x16xf32, #tpu.memory_space<vmem>>, %arg2: memref<16x256xbf16, #tpu.memory_space<vmem>>, %arg3: memref<1x256xf32, #tpu.memory_space<vmem>>, %arg4: memref<256x256xbf16, #tpu.memory_space<vmem>>, %arg5: memref<1x256xf32, #tpu.memory_space<vmem>>, %arg6: memref<256x128xbf16, #tpu.memory_space<vmem>>, %arg7: memref<1x128xf32, #tpu.memory_space<vmem>>, %arg8: memref<8x128xf32, #tpu.memory_space<vmem>>) attributes {dimension_semantics = [#tpu.dimension_semantics<parallel>], iteration_bounds = array<i64: 1>, scalar_prefetch = 0 : i64, scratch_operands = 0 : i64, tpu.core_type = #tpu.core_type<tc>, window_params = [{transform_indices = @transform_0, window_bounds = array<i64: 8, 16>}, {pipeline_mode = #tpu.pipeline_mode<synchronous>, transform_indices = @transform_1, window_bounds = array<i64: 16, 256>}, {pipeline_mode = #tpu.pipeline_mode<synchronous>, transform_indices = @transform_2, window_bounds = array<i64: 1, 256>}, {pipeline_mode = #tpu.pipeline_mode<synchronous>, transform_indices = @transform_3, window_bounds = array<i64: 256, 256>}, {pipeline_mode = #tpu.pipeline_mode<synchronous>, transform_indices = @transform_4, window_bounds = array<i64: 1, 256>}, {pipeline_mode = #tpu.pipeline_mode<synchronous>, transform_indices = @transform_5, window_bounds = array<i64: 256, 128>}, {pipeline_mode = #tpu.pipeline_mode<synchronous>, transform_indices = @transform_6, window_bounds = array<i64: 1, 128>}, {transform_indices = @transform_7, window_bounds = array<i64: 8, 128>}]} {
    %c0 = arith.constant 0 : index
    %c0_0 = arith.constant 0 : index
    %0 = vector.load %arg1[%c0, %c0_0] : memref<8x16xf32, #tpu.memory_space<vmem>>, vector<8x16xf32>
    %1 = arith.truncf %0 : vector<8x16xf32> to vector<8x16xbf16>
    %c0_1 = arith.constant 0 : index
    %c0_2 = arith.constant 0 : index
    %2 = vector.load %arg2[%c0_1, %c0_2] : memref<16x256xbf16, #tpu.memory_space<vmem>>, vector<16x256xbf16>
    %cst = arith.constant dense<0.000000e+00> : vector<8x256xf32>
    %3 = tpu.matmul %1, %2, %cst {dimension_numbers = #tpu.dot_dimension_numbers<[1], [0], [0], [1], [0, 0, 1, 1], [], []>} : vector<8x16xbf16>, vector<16x256xbf16>, vector<8x256xf32> -> vector<8x256xf32>
    %c0_3 = arith.constant 0 : index
    %c0_4 = arith.constant 0 : index
    %4 = vector.load %arg3[%c0_3, %c0_4] : memref<1x256xf32, #tpu.memory_space<vmem>>, vector<1x256xf32>
    %5 = vector.broadcast %4 : vector<1x256xf32> to vector<8x256xf32>
    %6 = arith.addf %3, %5 : vector<8x256xf32>
    %cst_5 = arith.constant 0.000000e+00 : f32
    %7 = vector.broadcast %cst_5 : f32 to vector<8x256xf32>
    %8 = arith.maximumf %6, %7 : vector<8x256xf32>
    %9 = arith.truncf %8 : vector<8x256xf32> to vector<8x256xbf16>
    %c0_6 = arith.constant 0 : index
    %c0_7 = arith.constant 0 : index
    %10 = vector.load %arg4[%c0_6, %c0_7] : memref<256x256xbf16, #tpu.memory_space<vmem>>, vector<256x256xbf16>
    %cst_8 = arith.constant dense<0.000000e+00> : vector<8x256xf32>
    %11 = tpu.matmul %9, %10, %cst_8 {dimension_numbers = #tpu.dot_dimension_numbers<[1], [0], [0], [1], [0, 0, 1, 1], [], []>} : vector<8x256xbf16>, vector<256x256xbf16>, vector<8x256xf32> -> vector<8x256xf32>
    %c0_9 = arith.constant 0 : index
    %c0_10 = arith.constant 0 : index
    %12 = vector.load %arg5[%c0_9, %c0_10] : memref<1x256xf32, #tpu.memory_space<vmem>>, vector<1x256xf32>
    %13 = vector.broadcast %12 : vector<1x256xf32> to vector<8x256xf32>
    %14 = arith.addf %11, %13 : vector<8x256xf32>
    %cst_11 = arith.constant 0.000000e+00 : f32
    %15 = vector.broadcast %cst_11 : f32 to vector<8x256xf32>
    %16 = arith.maximumf %14, %15 : vector<8x256xf32>
    %17 = arith.truncf %16 : vector<8x256xf32> to vector<8x256xbf16>
    %c0_12 = arith.constant 0 : index
    %c0_13 = arith.constant 0 : index
    %18 = vector.load %arg6[%c0_12, %c0_13] : memref<256x128xbf16, #tpu.memory_space<vmem>>, vector<256x128xbf16>
    %cst_14 = arith.constant dense<0.000000e+00> : vector<8x128xf32>
    %19 = tpu.matmul %17, %18, %cst_14 {dimension_numbers = #tpu.dot_dimension_numbers<[1], [0], [0], [1], [0, 0, 1, 1], [], []>} : vector<8x256xbf16>, vector<256x128xbf16>, vector<8x128xf32> -> vector<8x128xf32>
    %c0_15 = arith.constant 0 : index
    %c0_16 = arith.constant 0 : index
    %20 = vector.load %arg7[%c0_15, %c0_16] : memref<1x128xf32, #tpu.memory_space<vmem>>, vector<1x128xf32>
    %21 = vector.broadcast %20 : vector<1x128xf32> to vector<8x128xf32>
    %22 = arith.addf %19, %21 : vector<8x128xf32>
    %c0_17 = arith.constant 0 : index
    %c0_18 = arith.constant 0 : index
    %23 = vector.load %arg8[%c0_17, %c0_18] : memref<8x128xf32, #tpu.memory_space<vmem>>, vector<8x128xf32>
    tpu.vector_store %arg8[%c0_17, %c0_18], %22 {strides = array<i32>} : memref<8x128xf32, #tpu.memory_space<vmem>>, vector<8x128xf32>,
    return
  }
  func.func @transform_0(%arg0: i32) -> (i32, i32) {
    %c0_i32 = arith.constant 0 : i32
    %c0_i32_0 = arith.constant 0 : i32
    return %arg0, %c0_i32 : i32, i32
  }
  func.func @transform_1(%arg0: i32) -> (i32, i32) {
    %c0_i32 = arith.constant 0 : i32
    %c0_i32_0 = arith.constant 0 : i32
    %c0_i32_1 = arith.constant 0 : i32
    return %c0_i32, %c0_i32_0 : i32, i32
  }
  func.func @transform_2(%arg0: i32) -> (i32, i32) {
    %c0_i32 = arith.constant 0 : i32
    %c0_i32_0 = arith.constant 0 : i32
    %c0_i32_1 = arith.constant 0 : i32
    return %c0_i32, %c0_i32_0 : i32, i32
  }
  func.func @transform_3(%arg0: i32) -> (i32, i32) {
    %c0_i32 = arith.constant 0 : i32
    %c0_i32_0 = arith.constant 0 : i32
    %c0_i32_1 = arith.constant 0 : i32
    return %c0_i32, %c0_i32_0 : i32, i32
  }
  func.func @transform_4(%arg0: i32) -> (i32, i32) {
    %c0_i32 = arith.constant 0 : i32
    %c0_i32_0 = arith.constant 0 : i32
    %c0_i32_1 = arith.constant 0 : i32
    return %c0_i32, %c0_i32_0 : i32, i32
  }
  func.func @transform_5(%arg0: i32) -> (i32, i32) {
    %c0_i32 = arith.constant 0 : i32
    %c0_i32_0 = arith.constant 0 : i32
    %c0_i32_1 = arith.constant 0 : i32
    return %c0_i32, %c0_i32_0 : i32, i32
  }
  func.func @transform_6(%arg0: i32) -> (i32, i32) {
    %c0_i32 = arith.constant 0 : i32
    %c0_i32_0 = arith.constant 0 : i32
    %c0_i32_1 = arith.constant 0 : i32
    return %c0_i32, %c0_i32_0 : i32, i32
  }
  func.func @transform_7(%arg0: i32) -> (i32, i32) {
    %c0_i32 = arith.constant 0 : i32
    %c0_i32_0 = arith.constant 0 : i32
    return %arg0, %c0_i32 : i32, i32
  }
}

</mosaic_0001>

<bundles_post_ra>
// kernel: tpu_custom_call.1
= control target key start
LH: loop header
LB: loop body
LE: loop exit
PB: predicated region body
PF: predicated region fallthrough
CT: control target
= control target key end

     0   :  { %12 = vsyncpa [#allocation3], 0  ;;  %s992_s0 = inlined_call_operand.hbm [shape: f32[8,16], index: 0, kind: input, shape index: {}]   ;;  %s993_s1 = inlined_call_operand.hbm [shape: bf16[16,256], index: 1, kind: input, shape index: {}]   ;;  %s994_s2 = inlined_call_operand.vmem [shape: f32[1,256], index: 2, kind: input, shape index: {}]   ;;  %s995_s3 = inlined_call_operand.hbm [shape: bf16[256,256], index: 3, kind: input, shape index: {}]   ;;  %s996_s4 = inlined_call_operand.vmem [shape: f32[1,256], index: 4, kind: input, shape index: {}]   ;;  %s997_s5 = inlined_call_operand.hbm [shape: bf16[256,128], index: 5, kind: input, shape index: {}]   ;;  %s998_s6 = inlined_call_operand.vmem [shape: f32[1,128], index: 6, kind: input, shape index: {}]   ;;  %s999_s7 = inlined_call_operand.hbm [shape: f32[8,128], index: 7, kind: output, shape index: {}]  }
   0x1   :  { %13 = vsyncpa [#allocation6], 0 }
   0x2   :  { %14 = vsyncpa [#allocation9], 0 }
   0x3   :  { %15 = vsyncpa [#allocation4], 0  ;;  %s867_s24 = smov [#allocation5]   ;;  %s749_s28 = scalar_lea.hbm %s993_s1, 256 }
   0x4   :  { %s31_s25 = sshll.u32 %s867_s24, 4  ;;  %p750_p0 = scmp.ne.s32.totalorder %s993_s1, %s749_s28  ;;  %s32_s25 = int_to_ptr.vmem [resolvable:$true] %s31_s25 }
   0x5   :  { %p753_p1 = scmp.lt.u32.totalorder %s749_s28, %s993_s1 }
   0x7   :  { %p755_p2 = pnand %p753_p1, %p750_p0 }
   0x9   :  { %758 = shalt.err (!%p755_p2)
}
   0xa   :  { %s759_s10 = scalar_lea.vmem %s32_s25, 256  ;;  %p764_p4 = scmp.lt.s32.totalorder %s32_s25, %s32_s25 }
   0xb   :  { %p760_p3 = scmp.ne.s32.totalorder %s32_s25, %s759_s10  ;;  %p765_p5 = scmp.lt.s32.totalorder %s759_s10, %s759_s10 }
   0xd   :  { %p766_p6 = por %p765_p5, %p764_p4 }
   0xf   :  { %p767_p7 = pnand %p766_p6, %p760_p3 }
  0x11   :  { %770 = shalt.err (!%p767_p7)
}
  0x12   :  { %s868_s11 = smov 128   ;;  %s869_s12 = smov 8  }
  0x13   :  { %37 = dma.hbm_to_vmem [thread:$0]  %s993_s1, 256, %s32_s25, [#allocation6], %s868_s11, %s868_s11, %s869_s12  }
  0x14   :  { %s870_s15 = smov [#allocation2]   ;;  %s871_s17 = smov [#allocation7]  }
  0x15   :  { %s22_s16 = sshll.u32 %s870_s15, 4  ;;  %s45_s18 = sshll.u32 %s871_s17, 4  ;;  %s23_s16 = int_to_ptr.vmem [resolvable:$true] %s22_s16  ;;  %s46_s18 = int_to_ptr.vmem [resolvable:$true] %s45_s18 }
  0x16   :  { %s771_s21 = scalar_lea.hbm %s992_s0, 128 }
  0x17   :  { %p772_p8 = scmp.ne.s32.totalorder %s992_s0, %s771_s21  ;;  %p775_p9 = scmp.lt.u32.totalorder %s771_s21, %s992_s0 }
  0x19   :  { %p777_p10 = pnand %p775_p9, %p772_p8 }
  0x1b   :  { %780 = shalt.err (!%p777_p10)
}
  0x1c   :  { %s781_s1 = scalar_lea.vmem %s23_s16, 128  ;;  %p786_p12 = scmp.lt.s32.totalorder %s23_s16, %s23_s16 }
  0x1d   :  { %p782_p11 = scmp.ne.s32.totalorder %s23_s16, %s781_s1  ;;  %p787_p13 = scmp.lt.s32.totalorder %s781_s1, %s781_s1 }
  0x1f   :  { %p788_p0 = por %p787_p13, %p786_p12 }
  0x21   :  { %p789_p1 = pnand %p788_p0, %p782_p11 }
  0x23   :  { %792 = shalt.err (!%p789_p1)
}
  0x24   :  { %25 = dma.hbm_to_vmem [thread:$0]  %s992_s0, 128, %s23_s16, [#allocation3]  }
  0x25   :  { %s793_s30 = scalar_lea.hbm %s995_s3, 4096 }
  0x26   :  { %p794_p2 = scmp.ne.s32.totalorder %s995_s3, %s793_s30  ;;  %p797_p3 = scmp.lt.u32.totalorder %s793_s30, %s995_s3 }
  0x28   :  { %p799_p4 = pnand %p797_p3, %p794_p2 }
  0x2a   :  { %802 = shalt.err (!%p799_p4)
}
  0x2b   :  { %s803_s14 = scalar_lea.vmem %s46_s18, 4096  ;;  %p808_p6 = scmp.lt.s32.totalorder %s46_s18, %s46_s18 }
  0x2c   :  { %p804_p5 = scmp.ne.s32.totalorder %s46_s18, %s803_s14  ;;  %p809_p7 = scmp.lt.s32.totalorder %s803_s14, %s803_s14 }
  0x2e   :  { %p810_p8 = por %p809_p7, %p808_p6 }
  0x30   :  { %p811_p9 = pnand %p810_p8, %p804_p5 }
  0x32   :  { %814 = shalt.err (!%p811_p9)
}
  0x33   :  { %51 = dma.hbm_to_vmem [thread:$0]  %s995_s3, 4096, %s46_s18, [#allocation6], %s868_s11, %s868_s11, %s869_s12  }
  0x34   :  { %s872_s16 = smov [#allocation8]   ;;  %s815_s21 = scalar_lea.hbm %s997_s5, 2048 }
  0x35   :  { %s59_s17 = sshll.u32 %s872_s16, 4  ;;  %p816_p10 = scmp.ne.s32.totalorder %s997_s5, %s815_s21  ;;  %s60_s17 = int_to_ptr.vmem [resolvable:$true] %s59_s17 }
  0x36   :  { %p819_p11 = scmp.lt.u32.totalorder %s815_s21, %s997_s5 }
  0x38   :  { %p821_p12 = pnand %p819_p11, %p816_p10 }
  0x3a   :  { %824 = shalt.err (!%p821_p12)
}
  0x3b   :  { %s825_s1 = scalar_lea.vmem %s60_s17, 2048  ;;  %p830_p0 = scmp.lt.s32.totalorder %s60_s17, %s60_s17 }
  0x3c   :  { %p826_p13 = scmp.ne.s32.totalorder %s60_s17, %s825_s1  ;;  %p831_p1 = scmp.lt.s32.totalorder %s825_s1, %s825_s1 }
  0x3e   :  { %p832_p2 = por %p831_p1, %p830_p0 }
  0x40   :  { %p833_p3 = pnand %p832_p2, %p826_p13 }
  0x42   :  { %836 = shalt.err (!%p833_p3)
}
  0x43   :  { %s873_s3 = smov 64   ;;  %s874_s11 = smov 4  }
  0x44   :  { %65 = dma.hbm_to_vmem [thread:$0]  %s997_s5, 2048, %s60_s17, [#allocation9], %s873_s3, %s873_s3, %s874_s11  }
  0x45   :  { %859 = dma.done.wait [#allocation3], 128  }
  0x46   :  { %860 = vsyncadd [#allocation3], 4294967168 }
  0x47   :  { %861 = dma.done.wait [#allocation6], 4352  }
  0x48   :  { %862 = vsyncadd [#allocation6], 4294962944 }
  0x49   :  { %863 = dma.done.wait [#allocation9], 2048  }
  0x4a   :  { %864 = vsyncadd [#allocation9], 4294965248  ;;  %v875_v0 = vmov 0   ;;  %v682_v1 = vld [vmem:[#allocation5 + $0x4] ss:$8 sps:$4 sm:$0xff]   ;;  %v81_v3 = vld [vmem:[#allocation2] sm:$0xff]  ;;  %v87_v49 = vlaneseq }
  0x4b   :  { %143 = vmatprep.mubr.bf16.mxu0 %v875_v0  ;;  %v684_v2 = vld [vmem:[#allocation5] ss:$8 sps:$4 sm:$0xff]   ;;  %111 = vmatprep.subr.bf16.mxu0 %v682_v1  ;;  %v82_v4 = vpack.c.bf16 %v81_v3, %v81_v3  ;;  %v685_v5 = vld [vmem:[#allocation7 + $0x4] ss:$8 sps:$4 sm:$0xff]   ;;  %v687_v6 = vld [vmem:[#allocation7] ss:$8 sps:$4 sm:$0xff]  }
  0x4c   :  { %112 = vmatpush1.bf16.msra.mxu0 %v684_v2  ;;  %vm107_vm0 = vcmask 130048   ;;  %v688_v7 = vld [vmem:[#allocation7 + $0x14] ss:$8 sps:$4 sm:$0xff]   ;;  %360 = vmatprep.subr.bf16.mxu1 %v685_v5  ;;  %v690_v8 = vld [vmem:[#allocation7 + $0x10] ss:$8 sps:$4 sm:$0xff]   ;;  %v733_v37 = vld [vmem:[#allocation8 + $0x40] sm:$0xff]  }
  0x4d   :  { %361 = vmatpush1.bf16.msra.mxu1 %v687_v6  ;;  %v691_v9 = vld [vmem:[#allocation7 + $0x24] ss:$8 sps:$4 sm:$0xff]   ;;  %v693_v10 = vld [vmem:[#allocation7 + $0x20] ss:$8 sps:$4 sm:$0xff]   ;;  %v694_v11 = vld [vmem:[#allocation7 + $0x34] ss:$8 sps:$4 sm:$0xff]   ;;  %650 = vmatprep.subr.bf16.mxu0 %v733_v37 }
  0x4e   :  { %362 = vmatprep.subr.bf16.mxu1 %v688_v7  ;;  %v696_v12 = vld [vmem:[#allocation7 + $0x30] ss:$8 sps:$4 sm:$0xff]   ;;  %v697_v13 = vld [vmem:[#allocation7 + $0x44] ss:$8 sps:$4 sm:$0xff]   ;;  %v699_v14 = vld [vmem:[#allocation7 + $0x40] ss:$8 sps:$4 sm:$0xff]  }
  0x4f   :  { %600 = vmatmul.mubr.msk.bf16.vlgmr.msra.gmra.mrb[0].mxu0 %vm107_vm0, %v82_v4  ;;  %v700_v15 = vld [vmem:[#allocation7 + $0x54] ss:$8 sps:$4 sm:$0xff]   ;;  %v702_v16 = vld [vmem:[#allocation7 + $0x50] ss:$8 sps:$4 sm:$0xff]   ;;  %v703_v17 = vld [vmem:[#allocation7 + $0x64] ss:$8 sps:$4 sm:$0xff]  }
  0x50   :  { %v705_v18 = vld [vmem:[#allocation7 + $0x60] ss:$8 sps:$4 sm:$0xff]   ;;  %v706_v19 = vld [vmem:[#allocation7 + $0x74] ss:$8 sps:$4 sm:$0xff]   ;;  %v708_v20 = vld [vmem:[#allocation7 + $0x70] ss:$8 sps:$4 sm:$0xff]  }
  0x51   :  { %363 = vmatpush1.bf16.msra.mxu1 %v690_v8  ;;  %v709_v21 = vld [vmem:[#allocation7 + $0x84] ss:$8 sps:$4 sm:$0xff]   ;;  %v711_v22 = vld [vmem:[#allocation7 + $0x80] ss:$8 sps:$4 sm:$0xff]   ;;  %v712_v23 = vld [vmem:[#allocation7 + $0x94] ss:$8 sps:$4 sm:$0xff]  }
  0x52   :  { %364 = vmatprep.subr.bf16.mxu1 %v691_v9  ;;  %v714_v24 = vld [vmem:[#allocation7 + $0x90] ss:$8 sps:$4 sm:$0xff]   ;;  %v715_v25 = vld [vmem:[#allocation7 + $0xa4] ss:$8 sps:$4 sm:$0xff]   ;;  %v717_v26 = vld [vmem:[#allocation7 + $0xa0] ss:$8 sps:$4 sm:$0xff]  }
  0x53   :  { %v718_v27 = vld [vmem:[#allocation7 + $0xb4] ss:$8 sps:$4 sm:$0xff]   ;;  %v720_v28 = vld [vmem:[#allocation7 + $0xb0] ss:$8 sps:$4 sm:$0xff]   ;;  %v721_v29 = vld [vmem:[#allocation7 + $0xc4] ss:$8 sps:$4 sm:$0xff]  }
  0x54   :  { %v723_v30 = vld [vmem:[#allocation7 + $0xc0] ss:$8 sps:$4 sm:$0xff]   ;;  %v724_v31 = vld [vmem:[#allocation7 + $0xd4] ss:$8 sps:$4 sm:$0xff]   ;;  %v726_v32 = vld [vmem:[#allocation7 + $0xd0] ss:$8 sps:$4 sm:$0xff]  }
  0x55   :  { %365 = vmatpush1.bf16.msra.mxu1 %v693_v10  ;;  %v727_v33 = vld [vmem:[#allocation7 + $0xe4] ss:$8 sps:$4 sm:$0xff]   ;;  %v729_v34 = vld [vmem:[#allocation7 + $0xe0] ss:$8 sps:$4 sm:$0xff]   ;;  %v730_v35 = vld [vmem:[#allocation7 + $0xf4] ss:$8 sps:$4 sm:$0xff]  }
  0x56   :  { %366 = vmatprep.subr.bf16.mxu1 %v694_v11  ;;  %v732_v36 = vld [vmem:[#allocation7 + $0xf0] ss:$8 sps:$4 sm:$0xff]   ;;  %v734_v38 = vld [vmem:[#allocation8] sm:$0xff]   ;;  %v735_v39 = vld [vmem:[#allocation8 + $0x48] sm:$0xff]   ;;  %v88_v50 = vshrl.u32 %v87_v49, 7 }
  0x57   :  { %651 = vmatpush3.bf16.msra.mxu0 %v734_v38  ;;  %v736_v40 = vld [vmem:[#allocation8 + $0x8] sm:$0xff]   ;;  %v737_v41 = vld [vmem:[#allocation8 + $0x50] sm:$0xff]   ;;  %v739_v43 = vld [vmem:[#allocation8 + $0x58] sm:$0xff]  }
  0x58   :  { %652 = vmatprep.subr.bf16.mxu0 %v735_v39  ;;  %v738_v42 = vld [vmem:[#allocation8 + $0x10] sm:$0xff]   ;;  %v740_v44 = vld [vmem:[#allocation8 + $0x18] sm:$0xff]   ;;  %v741_v45 = vld [vmem:[#allocation8 + $0x60] sm:$0xff]   ;;  %v89_v51 = vsub.s32 0, %v88_v50  ;;  %v93_v53 = vsub.s32 1, %v88_v50 }
  0x59   :  { %367 = vmatpush1.bf16.msra.mxu1 %v696_v12  ;;  %v742_v46 = vld [vmem:[#allocation8 + $0x20] sm:$0xff]   ;;  %v743_v47 = vld [vmem:[#allocation8 + $0x68] sm:$0xff]   ;;  %v745_v2 = vld [vmem:[#allocation8 + $0x70] sm:$0xff]  }
  0x5a   :  { %368 = vmatprep.subr.bf16.mxu1 %v697_v13  ;;  %v744_v48 = vld [vmem:[#allocation8 + $0x28] sm:$0xff]   ;;  %v746_v3 = vld [vmem:[#allocation8 + $0x30] sm:$0xff]   ;;  %v747_v4 = vld [vmem:[#allocation8 + $0x78] sm:$0xff]  }
  0x5b   :  { %653 = vmatpush3.bf16.msra.mxu0 %v736_v40  ;;  %v85_v52 = vld [vmem:[%s994_s2] sm:$0x3]  ;;  %v748_v5 = vld [vmem:[#allocation8 + $0x38] sm:$0xff]  }
  0x5c   :  { %654 = vmatprep.subr.bf16.mxu0 %v737_v41  ;;  %v90_v54 = vrot.slane %v85_v52, %v89_v51  ;;  %v94_v55 = vrot.slane %v85_v52, %v93_v53  ;;  %v188_v6 = vld [vmem:[%s996_s4] sm:$0x3]  ;;  %s876_s4 = smov [#allocation10]  }
  0x5d   :  { %369 = vmatpush1.bf16.msra.mxu1 %v699_v14  ;;  %v193_v7 = vrot.slane %v188_v6, %v89_v51  ;;  %v197_v8 = vrot.slane %v188_v6, %v93_v53  ;;  %s587_s30 = sshll.u32 %s876_s4, 4  ;;  %s588_s30 = int_to_ptr.vmem [resolvable:$true] %s587_s30 }
  0x5e   :  { %370 = vmatprep.subr.bf16.mxu1 %v700_v15  ;;  %s837_s8 = scalar_lea.vmem %s588_s30, 128  ;;  %p842_p5 = scmp.lt.s32.totalorder %s588_s30, %s588_s30 }
  0x5f   :  { %655 = vmatpush3.bf16.msra.mxu0 %v738_v42  ;;  %p838_p4 = scmp.ne.s32.totalorder %s588_s30, %s837_s8  ;;  %p843_p6 = scmp.lt.s32.totalorder %s837_s8, %s837_s8 }
  0x60   :  { %656 = vmatprep.subr.bf16.mxu0 %v739_v43 }
  0x61   :  { %371 = vmatpush1.bf16.msra.mxu1 %v702_v16  ;;  %p844_p7 = por %p843_p6, %p842_p5 }
  0x62   :  { %372 = vmatprep.subr.bf16.mxu1 %v703_v17 }
  0x63   :  { %657 = vmatpush3.bf16.msra.mxu0 %v740_v44  ;;  %p845_p8 = pnand %p844_p7, %p838_p4 }
  0x64   :  { %658 = vmatprep.subr.bf16.mxu0 %v741_v45 }
  0x65   :  { %373 = vmatpush1.bf16.msra.mxu1 %v705_v18 }
  0x66   :  { %374 = vmatprep.subr.bf16.mxu1 %v706_v19 }
  0x67   :  { %659 = vmatpush3.bf16.msra.mxu0 %v742_v46 }
  0x68   :  { %660 = vmatprep.subr.bf16.mxu0 %v743_v47 }
  0x69   :  { %375 = vmatpush1.bf16.msra.mxu1 %v708_v20  ;;  %v633_v20 = vld [vmem:[%s998_s6] ss:$0 sm:$0xff] }
  0x6a   :  { %376 = vmatprep.subr.bf16.mxu1 %v709_v21 }
  0x6b   :  { %661 = vmatpush3.bf16.msra.mxu0 %v744_v48 }
  0x6c   :  { %662 = vmatprep.subr.bf16.mxu0 %v745_v2 }
  0x6d   :  { %377 = vmatpush1.bf16.msra.mxu1 %v711_v22 }
  0x6e   :  { %378 = vmatprep.subr.bf16.mxu1 %v712_v23 }
  0x6f   :  { %663 = vmatpush3.bf16.msra.mxu0 %v746_v3 }
  0x70   :  { %664 = vmatprep.subr.bf16.mxu0 %v747_v4 }
  0x71   :  { %379 = vmatpush1.bf16.msra.mxu1 %v714_v24 }
  0x72   :  { %380 = vmatprep.subr.bf16.mxu1 %v715_v25 }
  0x73   :  { %665 = vmatpush3.bf16.msra.mxu0 %v748_v5 }
  0x75   :  { %381 = vmatpush1.bf16.msra.mxu1 %v717_v26 }
  0x76   :  { %382 = vmatprep.subr.bf16.mxu1 %v718_v27 }
  0x79   :  { %383 = vmatpush1.bf16.msra.mxu1 %v720_v28 }
  0x7a   :  { %384 = vmatprep.subr.bf16.mxu1 %v721_v29 }
  0x7d   :  { %385 = vmatpush1.bf16.msra.mxu1 %v723_v30 }
  0x7e   :  { %386 = vmatprep.subr.bf16.mxu1 %v724_v31 }
  0x81   :  { %387 = vmatpush1.bf16.msra.mxu1 %v726_v32 }
  0x82   :  { %388 = vmatprep.subr.bf16.mxu1 %v727_v33 }
  0x85   :  { %389 = vmatpush1.bf16.msra.mxu1 %v729_v34 }
  0x86   :  { %390 = vmatprep.subr.bf16.mxu1 %v730_v35 }
  0x89   :  { %391 = vmatpush1.bf16.msra.mxu1 %v732_v36 }
 0x122   :  { %v145_v56 = vpop.f32.mrb[0].mxu0 }
 0x123   :  { %v146_v57 = vadd.f32 %v145_v56, %v90_v54  ;;  %v147_v58 = vpop.f32.mrb[1].mxu0 }
 0x124   :  { %v148_v59 = vadd.f32 %v147_v58, %v94_v55  ;;  %v149_v60 = vpop.f32.mrb[2].mxu0 }
 0x125   :  { %v152_v61 = vmax.f32 %v146_v57, 0.0  ;;  %v150_v62 = vpop.f32.mrb[3].mxu0 }
 0x126   :  { %v153_v63 = vmax.f32 %v148_v59, 0.0 }
 0x127   :  { %v154_v1 = vpack.c.bf16 %v152_v61, %v152_v61 }
 0x128   :  { %v155_v0 = vpack.c.bf16 %v153_v63, %v153_v63 }
 0x12a   :  { %392 = vmatprep.mubr.bf16.mxu1 %v155_v0 }
 0x12b   :  { %393 = vmatmul.mubr.bf16.vlgmr.msra.gmra.mrb[0].mxu1 %v154_v1 }
 0x1fe   :  { %v394_v9 = vpop.f32.mrb[0].mxu1 }
 0x1ff   :  { %v395_v10 = vadd.f32 %v394_v9, %v193_v7  ;;  %v396_v11 = vpop.f32.mrb[1].mxu1 }
 0x200   :  { %v397_v12 = vadd.f32 %v396_v11, %v197_v8  ;;  %v398_v13 = vpop.f32.mrb[2].mxu1 }
 0x201   :  { %v401_v14 = vmax.f32 %v395_v10, 0.0  ;;  %v399_v15 = vpop.f32.mrb[3].mxu1 }
 0x202   :  { %v402_v16 = vmax.f32 %v397_v12, 0.0 }
 0x203   :  { %v403_v18 = vpack.c.bf16 %v401_v14, %v401_v14 }
 0x204   :  { %v404_v17 = vpack.c.bf16 %v402_v16, %v402_v16 }
 0x206   :  { %572 = vmatprep.mubr.bf16.mxu0 %v404_v17 }
 0x207   :  { %573 = vmatmul.mubr.bf16.vlgmr.msra.gmra.mrb[4].mxu0 %v403_v18 }
 0x2da   :  { %v666_v19 = vpop.f32.mrb[4].mxu0 }
 0x2db   :  { %v667_v21 = vpop.f32.mrb[5].mxu0 }
 0x2dc   :  { %v668_v22 = vadd.f32 %v667_v21, %v666_v19  ;;  %v669_v23 = vpop.f32.mrb[6].mxu0 }
 0x2dd   :  { %v670_v24 = vpop.f32.mrb[7].mxu0 }
 0x2de   :  { %v575_v25 = vadd.f32 %v668_v22, %v633_v20 }
 0x2e0   :  { %580 = vst [vmem:[#allocation10] sm:$0xff] %v575_v25 }
 0x2e1   :  { %848 = shalt.err (!%p845_p8)
}
 0x2e2   :  { %s849_s6 = scalar_lea.hbm %s999_s7, 128 }
 0x2e3   :  { %p850_p9 = scmp.ne.s32.totalorder %s999_s7, %s849_s6  ;;  %p853_p10 = scmp.lt.u32.totalorder %s849_s6, %s999_s7 }
 0x2e5   :  { %p855_p11 = pnand %p853_p10, %p850_p9 }
 0x2e7   :  { %858 = shalt.err (!%p855_p11)
}
 0x2e8   :  { %590 = dma.vmem_to_hbm [thread:$0]  %s588_s30, 128, %s999_s7, [#allocation4]  }
 0x2e9   :  { %865 = dma.done.wait [#allocation4], 128  }
 0x2ea   :  { %866 = vsyncadd [#allocation4], 4294967168 }
 0x2eb   :  { %594 = vsyncpa [#allocation3], 1 }
 0x2ec   :  { %595 = vsyncpa [#allocation6], 1 }
 0x2ed   :  { %596 = vsyncpa [#allocation9], 1 }
 0x2ee   :  { %597 = vsyncpa [#allocation4], 1 }

</bundles_post_ra>
